<compile_context>
chip_gen: v5e
topology: v5e:2x2
jax: 0.10.0
libtpu: 0.0.40
codegen_flags: <defaults>
</compile_context>

<pallas_src>
import functools

import jax
import jax.numpy as jnp
from jax import lax
from jax.experimental import pallas as pl
from jax.experimental.pallas import tpu as pltpu

LANES = 128
SUBLANES = 8


def _device_kind():
    try:
        return jax.devices()[0].device_kind.lower()
    except Exception:
        return ""


def _is_v7():
    k = _device_kind()
    return ("v7" in k) or ("tpu7" in k)


def _default_tile_rows():
    # 8192x128 f32 = 4 MiB / block on v7x; 4096x128 = 2 MiB elsewhere.
    return 8192 if _is_v7() else 4096


def _default_num_cores():
    return 2 if _is_v7() else 1


def _focal_bce_partial_kernel(p_ref, t_ref, out_ref, acc_ref, *,
                              rows, tiles_per_core, tile_rows,
                              binary_targets, need_mask):
    """Accumulates the sum of per-element BCE over this core's row range.

    p_ref / t_ref : (tile_rows, 128) f32 blocks.
    out_ref       : (1, 8, 128) f32 per-core partial sums (resident over axis 1).
    acc_ref       : (8, 128) f32 VMEM scratch accumulator.
    """
    c = pl.program_id(0)
    i = pl.program_id(1)

    @pl.when(i == 0)
    def _init():
        acc_ref[...] = jnp.zeros_like(acc_ref)

    p = p_ref[...]
    t = t_ref[...]

    if binary_targets:
        # Exact for {0,1} targets: one EUP log per element instead of two.
        chosen = jnp.where(t > 0.5, p, 1.0 - p)
        bce = -jnp.maximum(jnp.log(chosen), -100.0)
    else:
        # General soft-label path; matches F.binary_cross_entropy exactly
        # (each log term clamped at -100).
        log_p = jnp.maximum(jnp.log(p), -100.0)
        log_1mp = jnp.maximum(jnp.log(1.0 - p), -100.0)
        bce = -(t * log_p + (1.0 - t) * log_1mp)

    if need_mask:
        # Only a partial last grid tile (or a clamped duplicate tile on the
        # second core) needs masking: one (tile_rows, 1) row-iota compare.
        g = c * tiles_per_core + i                    # global tile index (unclamped)
        rows_remaining = rows - g * tile_rows
        row_ids = lax.broadcasted_iota(jnp.int32, (tile_rows, 1), 0)
        bce = jnp.where(row_ids < rows_remaining, bce, 0.0)

    # Plain vreg adds into an (8,128) accumulator; no per-tile XLU reduce.
    r8 = (tile_rows // SUBLANES) * SUBLANES
    if r8:
        head = bce if r8 == tile_rows else bce[:r8]
        acc_ref[...] += jnp.sum(head.reshape(r8 // SUBLANES, SUBLANES, LANES), axis=0)
    rem = tile_rows - r8
    if rem:  # only reachable for a tiny single-tile launch (rows < next mult of 8)
        acc_ref[0:rem, :] += bce[r8:, :]

    @pl.when(i == pl.num_programs(1) - 1)
    def _finalize():
        out_ref[0] = acc_ref[...]


def focal_loss(inputs, targets, alpha=1.0, gamma=2.0,
               assume_binary_targets=False, tile_rows=None, num_cores=None):
    """Matches FocalLoss(alpha, gamma).forward(inputs, targets); scalar f32.

    assume_binary_targets=True enables the single-log BCE path; it is exact
    only for targets in {0, 1} (soft labels must use the default two-log path).
    """
    p = jnp.squeeze(inputs).astype(jnp.float32)        # PyTorch .squeeze()
    t = jnp.asarray(targets).astype(jnp.float32)       # PyTorch .float()
    assert p.shape == t.shape, (p.shape, t.shape)

    n_elems = int(p.size)
    p_flat = p.reshape(-1)
    t_flat = t.reshape(-1)

    rows = n_elems // LANES
    bulk = rows * LANES

    if tile_rows is None:
        tile_rows = _default_tile_rows()
    if num_cores is None:
        num_cores = _default_num_cores()

    if rows > 0:
        # Lane-aligned bulk.  In the common aligned case this slice is the
        # full array (elided by XLA) -> no extra HBM pass, no jnp.pad.
        p2d = p_flat[:bulk].reshape(rows, LANES)
        t2d = t_flat[:bulk].reshape(rows, LANES)

        tr = min(int(tile_rows), rows)
        if tr < rows:
            tr = max(SUBLANES, (tr // SUBLANES) * SUBLANES)
        total_tiles = pl.cdiv(rows, tr)

        nc = max(1, min(int(num_cores), total_tiles))
        tiles_per_core = pl.cdiv(total_tiles, nc)
        clamp_needed = (nc * tiles_per_core != total_tiles)
        need_mask = (rows % tr != 0) or clamp_needed

        if clamp_needed:
            def in_map(c, i):
                g = jnp.minimum(c * tiles_per_core + i, total_tiles - 1)
                return (g, 0)
        else:
            def in_map(c, i):
                return (c * tiles_per_core + i, 0)

        kernel = functools.partial(
            _focal_bce_partial_kernel,
            rows=rows,
            tiles_per_core=tiles_per_core,
            tile_rows=tr,
            binary_targets=bool(assume_binary_targets),
            need_mask=bool(need_mask),
        )

        block_bytes = tr * LANES * 4
        vmem_limit = max(32 * 1024 * 1024,
                         min(2 * 2 * block_bytes + (4 << 20), 60 * 1024 * 1024))

        partials = pl.pallas_call(
            kernel,
            out_shape=jax.ShapeDtypeStruct((nc, SUBLANES, LANES), jnp.float32),
            grid_spec=pltpu.PrefetchScalarGridSpec(
                num_scalar_prefetch=0,
                grid=(nc, tiles_per_core),
                in_specs=[
                    pl.BlockSpec((tr, LANES), in_map),
                    pl.BlockSpec((tr, LANES), in_map),
                ],
                out_specs=pl.BlockSpec((1, SUBLANES, LANES), lambda c, i: (c, 0, 0)),
                scratch_shapes=[pltpu.VMEM((SUBLANES, LANES), jnp.float32)],
            ),
            compiler_params=pltpu.CompilerParams(
                dimension_semantics=("parallel", "arbitrary"),
                vmem_limit_bytes=int(vmem_limit),
            ),
        )(p2d, t2d)
        bulk_sum = jnp.sum(partials)
    else:
        bulk_sum = jnp.float32(0.0)

    tail = n_elems - bulk
    if tail:
        # <= 127 trailing elements: tiny plain-JAX fold (always the exact path).
        p_t = p_flat[bulk:]
        t_t = t_flat[bulk:]
        log_p = jnp.maximum(jnp.log(p_t), -100.0)
        log_1mp = jnp.maximum(jnp.log(1.0 - p_t), -100.0)
        tail_sum = jnp.sum(-(t_t * log_p + (1.0 - t_t) * log_1mp))
    else:
        tail_sum = jnp.float32(0.0)

    # Mean + focal modulation: tiny scalar ops, kept outside the kernel.
    bce = (bulk_sum + tail_sum) / jnp.float32(n_elems)
    return (jnp.float32(alpha)
            * (1.0 - jnp.exp(-bce)) ** jnp.float32(gamma)
            * bce)


def focal_loss_ref(inputs, targets, alpha=1.0, gamma=2.0):
    """Pure-JAX reference matching PyTorch semantics."""
    p = jnp.squeeze(inputs).astype(jnp.float32)
    t = jnp.asarray(targets).astype(jnp.float32)
    log_p = jnp.maximum(jnp.log(p), -100.0)
    log_1mp = jnp.maximum(jnp.log(1.0 - p), -100.0)
    bce = jnp.mean(-(t * log_p + (1.0 - t) * log_1mp))
    return alpha * (1.0 - jnp.exp(-bce)) ** gamma * bce


if __name__ == "__main__":
    key = jax.random.PRNGKey(0)
    k1, k2, k3, k4 = jax.random.split(key, 4)

    # Primary check: NCHW with squeezable channel dim (module's intended use),
    # lane-aligned element count -> no slice/pad, single full-extent tile.
    inputs = jax.nn.sigmoid(jax.random.normal(k1, (2, 1, 64, 64), dtype=jnp.float32))
    targets = (jax.random.uniform(k2, (2, 64, 64), dtype=jnp.float32) > 0.5
               ).astype(jnp.float32)

    ref = jax.block_until_ready(focal_loss_ref(inputs, targets, 1.0, 2.0))
    loss = jax.block_until_ready(focal_loss(inputs, targets, alpha=1.0, gamma=2.0))
    assert jnp.allclose(loss, ref, rtol=1e-5, atol=1e-6), (loss, ref)
    loss_b = jax.block_until_ready(
        focal_loss(inputs, targets, 1.0, 2.0, assume_binary_targets=True))
    assert jnp.allclose(loss_b, ref, rtol=1e-5, atol=1e-6), (loss_b, ref)

    # Secondary check: ragged element count (2*40*33 = 2640 -> 20 bulk rows +
    # 80-element tail), forced multi-tile grid (tile_rows=8) and a forced
    # size-2 "parallel" axis with an uneven tile split -> exercises the
    # partial-tile row mask and the clamped duplicate tile on core 1.
    inputs2 = jax.nn.sigmoid(jax.random.normal(k3, (2, 1, 40, 33), dtype=jnp.float32))
    targets2_bin = (jax.random.uniform(k4, (2, 40, 33), dtype=jnp.float32) > 0.5
                    ).astype(jnp.float32)
    targets2_soft = jax.random.uniform(k4, (2, 40, 33), dtype=jnp.float32)

    r2 = jax.block_until_ready(focal_loss_ref(inputs2, targets2_bin, 1.0, 2.0))
    l2 = jax.block_until_ready(
        focal_loss(inputs2, targets2_bin, 1.0, 2.0,
                   assume_binary_targets=True, tile_rows=8, num_cores=2))
    assert jnp.allclose(l2, r2, rtol=1e-5, atol=1e-6), (l2, r2)

    r3 = jax.block_until_ready(focal_loss_ref(inputs2, targets2_soft, 1.0, 2.0))
    l3 = jax.block_until_ready(
        focal_loss(inputs2, targets2_soft, 1.0, 2.0, tile_rows=8, num_cores=2))
    assert jnp.allclose(l3, r3, rtol=1e-5, atol=1e-6), (l3, r3)

    # Same ragged input with default tiling: single full-extent tile whose row
    # count (20) is not a multiple of 8 -> exercises the sub-sublane remainder
    # accumulation path with masking compiled out.
    l5 = jax.block_until_ready(focal_loss(inputs2, targets2_soft, 1.0, 2.0))
    assert jnp.allclose(l5, r3, rtol=1e-5, atol=1e-6), (l5, r3)

    # Tiny input (< 128 elements): pure-JAX tail path, no kernel launch.
    inputs3 = jax.nn.sigmoid(jax.random.normal(k1, (1, 1, 5, 7), dtype=jnp.float32))
    targets3 = (jax.random.uniform(k2, (5, 7), dtype=jnp.float32) > 0.5
                ).astype(jnp.float32)
    r4 = jax.block_until_ready(focal_loss_ref(inputs3, targets3, 1.0, 2.0))
    l4 = jax.block_until_ready(focal_loss(inputs3, targets3, 1.0, 2.0))
    assert jnp.allclose(l4, r4, rtol=1e-5, atol=1e-6), (l4, r4)

    print("KERNEL_OK")
</pallas_src>

<mosaic_0001>
module attributes {stable_mosaic.version = 11 : i64} {
  func.func @_focal_bce_partial_kernel(%arg0: i32, %arg1: i32, %arg2: memref<64x128xf32, #tpu.memory_space<vmem>>, %arg3: memref<64x128xf32, #tpu.memory_space<vmem>>, %arg4: memref<1x8x128xf32, #tpu.memory_space<vmem>>, %arg5: memref<8x128xf32, #tpu.memory_space<vmem>>) attributes {dimension_semantics = [#tpu.dimension_semantics<parallel>, #tpu.dimension_semantics<arbitrary>], iteration_bounds = array<i64: 1, 1>, scalar_prefetch = 0 : i64, scratch_operands = 1 : i64, tpu.core_type = #tpu.core_type<tc>, window_params = [{transform_indices = @transform_0, window_bounds = array<i64: 64, 128>}, {transform_indices = @transform_1, window_bounds = array<i64: 64, 128>}, {transform_indices = @transform_2, window_bounds = array<i64: 1, 8, 128>}]} {
    %c0_i32 = arith.constant 0 : i32
    %0 = arith.cmpi eq, %arg1, %c0_i32 : i32
    %1 = arith.extui %0 : i1 to i32
    %c0_i32_0 = arith.constant 0 : i32
    %2 = arith.cmpi ne, %1, %c0_i32_0 : i32
    scf.if %2 {
      %cst_15 = arith.constant 0.000000e+00 : f32
      %28 = vector.broadcast %cst_15 : f32 to vector<8x128xf32>
      %c0_16 = arith.constant 0 : index
      %c0_17 = arith.constant 0 : index
      %29 = vector.load %arg5[%c0_16, %c0_17] : memref<8x128xf32, #tpu.memory_space<vmem>>, vector<8x128xf32>
      tpu.vector_store %arg5[%c0_16, %c0_17], %28 {strides = array<i32>} : memref<8x128xf32, #tpu.memory_space<vmem>>, vector<8x128xf32>,
    } else {
    }
    %c0 = arith.constant 0 : index
    %c0_1 = arith.constant 0 : index
    %3 = vector.load %arg2[%c0, %c0_1] : memref<64x128xf32, #tpu.memory_space<vmem>>, vector<64x128xf32>
    %c0_2 = arith.constant 0 : index
    %c0_3 = arith.constant 0 : index
    %4 = vector.load %arg3[%c0_2, %c0_3] : memref<64x128xf32, #tpu.memory_space<vmem>>, vector<64x128xf32>
    %5 = math.log %3 : vector<64x128xf32>
    %cst = arith.constant -1.000000e+02 : f32
    %6 = vector.broadcast %cst : f32 to vector<64x128xf32>
    %7 = arith.maximumf %5, %6 : vector<64x128xf32>
    %cst_4 = arith.constant 1.000000e+00 : f32
    %8 = vector.broadcast %cst_4 : f32 to vector<64x128xf32>
    %9 = arith.subf %8, %3 : vector<64x128xf32>
    %10 = math.log %9 : vector<64x128xf32>
    %cst_5 = arith.constant -1.000000e+02 : f32
    %11 = vector.broadcast %cst_5 : f32 to vector<64x128xf32>
    %12 = arith.maximumf %10, %11 : vector<64x128xf32>
    %13 = arith.mulf %4, %7 : vector<64x128xf32>
    %cst_6 = arith.constant 1.000000e+00 : f32
    %14 = vector.broadcast %cst_6 : f32 to vector<64x128xf32>
    %15 = arith.subf %14, %4 : vector<64x128xf32>
    %16 = arith.mulf %15, %12 : vector<64x128xf32>
    %17 = arith.addf %13, %16 : vector<64x128xf32>
    %cst_7 = arith.constant 0.000000e+00 : f32
    %18 = vector.broadcast %cst_7 : f32 to vector<64x128xf32>
    %19 = arith.subf %18, %17 : vector<64x128xf32>
    %c0_8 = arith.constant 0 : index
    %c0_9 = arith.constant 0 : index
    %20 = vector.load %arg5[%c0_8, %c0_9] : memref<8x128xf32, #tpu.memory_space<vmem>>, vector<8x128xf32>
    %21 = vector.shape_cast %19 : vector<64x128xf32> to vector<8x8x128xf32>
    %cst_10 = arith.constant dense<0.000000e+00> : vector<8x128xf32>
    %22 = vector.multi_reduction <add>, %21, %cst_10 [0] : vector<8x8x128xf32> to vector<8x128xf32>
    %23 = arith.addf %20, %22 : vector<8x128xf32>
    %c0_11 = arith.constant 0 : index
    %c0_12 = arith.constant 0 : index
    %24 = vector.load %arg5[%c0_11, %c0_12] : memref<8x128xf32, #tpu.memory_space<vmem>>, vector<8x128xf32>
    tpu.vector_store %arg5[%c0_11, %c0_12], %23 {strides = array<i32>} : memref<8x128xf32, #tpu.memory_space<vmem>>, vector<8x128xf32>,
    %c0_i32_13 = arith.constant 0 : i32
    %25 = arith.cmpi eq, %arg1, %c0_i32_13 : i32
    %26 = arith.extui %25 : i1 to i32
    %c0_i32_14 = arith.constant 0 : i32
    %27 = arith.cmpi ne, %26, %c0_i32_14 : i32
    scf.if %27 {
      %c0_15 = arith.constant 0 : index
      %c0_16 = arith.constant 0 : index
      %28 = vector.load %arg5[%c0_15, %c0_16] : memref<8x128xf32, #tpu.memory_space<vmem>>, vector<8x128xf32>
      %c0_17 = arith.constant 0 : index
      %c0_18 = arith.constant 0 : index
      %c0_19 = arith.constant 0 : index
      %29 = vector.load %arg4[%c0_17, %c0_18, %c0_19] : memref<1x8x128xf32, #tpu.memory_space<vmem>>, vector<1x8x128xf32>
      %30 = vector.shape_cast %29 : vector<1x8x128xf32> to vector<8x128xf32>
      %31 = vector.shape_cast %28 : vector<8x128xf32> to vector<1x8x128xf32>
      tpu.vector_store %arg4[%c0_17, %c0_18, %c0_19], %31 {strides = array<i32>} : memref<1x8x128xf32, #tpu.memory_space<vmem>>, vector<1x8x128xf32>,
    } else {
    }
    return
  }
  func.func @transform_0(%arg0: i32, %arg1: i32) -> (i32, i32) {
    %c1_i32 = arith.constant 1 : i32
    %0 = arith.muli %arg0, %c1_i32 : i32
    %1 = arith.addi %0, %arg1 : i32
    %c0_i32 = arith.constant 0 : i32
    %c0_i32_0 = arith.constant 0 : i32
    return %1, %c0_i32 : i32, i32
  }
  func.func @transform_1(%arg0: i32, %arg1: i32) -> (i32, i32) {
    %c1_i32 = arith.constant 1 : i32
    %0 = arith.muli %arg0, %c1_i32 : i32
    %1 = arith.addi %0, %arg1 : i32
    %c0_i32 = arith.constant 0 : i32
    %c0_i32_0 = arith.constant 0 : i32
    return %1, %c0_i32 : i32, i32
  }
  func.func @transform_2(%arg0: i32, %arg1: i32) -> (i32, i32, i32) {
    %c0_i32 = arith.constant 0 : i32
    %c0_i32_0 = arith.constant 0 : i32
    %c0_i32_1 = arith.constant 0 : i32
    return %arg0, %c0_i32, %c0_i32_0 : i32, i32, i32
  }
}

</mosaic_0001>

<bundles_post_ra>
// kernel: tpu_custom_call.1
= control target key start
LH: loop header
LB: loop body
LE: loop exit
PB: predicated region body
PF: predicated region fallthrough
CT: control target
= control target key end

     0   :  { %7 = vsyncpa [#allocation4], 0  ;;  %s382_s0 = inlined_call_operand.hbm [shape: f32[64,128], index: 0, kind: input, shape index: {}]   ;;  %s383_s1 = inlined_call_operand.hbm [shape: f32[64,128], index: 1, kind: input, shape index: {}]   ;;  %s384_s2 = inlined_call_operand.hbm [shape: f32[1,8,128], index: 2, kind: output, shape index: {}]  }
   0x1   :  { %8 = vsyncpa [#allocation7], 0 }
   0x2   :  { %9 = vsyncpa [#allocation5], 0  ;;  %s18_s11 = sshll.u32 %s382_s0, 4  ;;  %s321_s12 = smov [#allocation3]   ;;  %s19_s11 = int_to_ptr.hbm [resolvable:$true] %s18_s11 }
   0x3   :  { %s20_s13 = sshll.u32 %s321_s12, 4  ;;  %s35_s16 = sshll.u32 %s383_s1, 4  ;;  %s21_s13 = int_to_ptr.vmem [resolvable:$true] %s20_s13  ;;  %s36_s16 = int_to_ptr.hbm [resolvable:$true] %s35_s16 }
   0x4   :  { %s322_s17 = smov 128   ;;  %s323_s18 = smov 8  }
   0x5   :  { %26 = dma.hbm_to_vmem [thread:$0]  %s19_s11, 1024, %s21_s13, [#allocation4], %s322_s17, %s322_s17, %s323_s18  }
   0x6   :  { %s324_s19 = smov [#allocation6]  }
   0x7   :  { %s37_s20 = sshll.u32 %s324_s19, 4  ;;  %s38_s20 = int_to_ptr.vmem [resolvable:$true] %s37_s20 }
   0x8   :  { %43 = dma.hbm_to_vmem [thread:$0]  %s36_s16, 1024, %s38_s20, [#allocation7], %s322_s17, %s322_s17, %s323_s18  }
   0x9   :  { %315 = dma.done.wait [#allocation4], 1024  }
   0xa   :  { %316 = vsyncadd [#allocation4], 4294966272 }
   0xb   :  { %317 = dma.done.wait [#allocation7], 1024  }
   0xc   :  { %318 = vsyncadd [#allocation7], 4294966272  ;;  %v61_v0 = vld [vmem:[#allocation3] sm:$0xff]  ;;  %v62_v1 = vld [vmem:[#allocation3 + $0x8] sm:$0xff]  ;;  %s325_s0 = smov [#allocation8]   ;;  %s195_s23 = sshll.u32 %s384_s2, 4  ;;  %s196_s23 = int_to_ptr.hbm [resolvable:$true] %s195_s23 }
   0xd   :  { %211 = vlog2.f32 %v61_v0  ;;  %v63_v2 = vld [vmem:[#allocation3 + $0x10] sm:$0xff]  ;;  %v64_v3 = vld [vmem:[#allocation3 + $0x18] sm:$0xff]  ;;  %v65_v4 = vld [vmem:[#allocation3 + $0x20] sm:$0xff]  ;;  %v101_v8 = vsub.f32 1.0, %v61_v0  ;;  %v102_v9 = vsub.f32 1.0, %v62_v1  ;;  %s193_s1 = sshll.u32 %s325_s0, 4  ;;  %s194_s1 = int_to_ptr.vmem [resolvable:$true] %s193_s1 }
   0xe   :  { %213 = vlog2.f32 %v62_v1  ;;  %v66_v5 = vld [vmem:[#allocation3 + $0x28] sm:$0xff]  ;;  %v67_v6 = vld [vmem:[#allocation3 + $0x30] sm:$0xff]  ;;  %v68_v7 = vld [vmem:[#allocation3 + $0x38] sm:$0xff]  ;;  %v103_v13 = vsub.f32 1.0, %v63_v2  ;;  %v104_v14 = vsub.f32 1.0, %v64_v3  ;;  %v105_v15 = vsub.f32 1.0, %v65_v4 }
   0xf   :  { %215 = vlog2.f32 %v63_v2  ;;  %v347_v11 = vld [vmem:[#allocation6] sm:$0xff]  ;;  %v349_v12 = vld [vmem:[#allocation6 + $0x8] sm:$0xff]  ;;  %v351_v17 = vld [vmem:[#allocation6 + $0x10] sm:$0xff]  ;;  %v106_v19 = vsub.f32 1.0, %v66_v5  ;;  %v107_v20 = vsub.f32 1.0, %v67_v6  ;;  %v108_v21 = vsub.f32 1.0, %v68_v7 }
  0x10   :  { %217 = vlog2.f32 %v64_v3  ;;  %v353_v18 = vld [vmem:[#allocation6 + $0x18] sm:$0xff]  ;;  %v355_v23 = vld [vmem:[#allocation6 + $0x20] sm:$0xff]  ;;  %v357_v24 = vld [vmem:[#allocation6 + $0x28] sm:$0xff]  ;;  %v141_v29 = vsub.f32 1.0, %v347_v11  ;;  %v142_v30 = vsub.f32 1.0, %v349_v12  ;;  %v143_v33 = vsub.f32 1.0, %v351_v17 }
  0x11   :  { %219 = vlog2.f32 %v65_v4  ;;  %v144_v34 = vsub.f32 1.0, %v353_v18  ;;  %v363_v36 = vld [vmem:[#allocation6 + $0x30] sm:$0xff]  ;;  %v145_v38 = vsub.f32 1.0, %v355_v23  ;;  %v146_v39 = vsub.f32 1.0, %v357_v24  ;;  %v367_v41 = vld [vmem:[#allocation6 + $0x38] sm:$0xff] }
  0x12   :  { %221 = vlog2.f32 %v66_v5  ;;  %v147_v52 = vsub.f32 1.0, %v363_v36  ;;  %v148_v56 = vsub.f32 1.0, %v367_v41 }
  0x13   :  { %v212_v10 = vpop.eup %211  ;;  %223 = vlog2.f32 %v67_v6 }
  0x14   :  { %v214_v16 = vpop.eup %213  ;;  %225 = vlog2.f32 %v68_v7  ;;  %v78_v25 = vmul.f32 0.6931472, %v212_v10 }
  0x15   :  { %v216_v22 = vpop.eup %215  ;;  %v80_v26 = vmul.f32 0.6931472, %v214_v16  ;;  %227 = vlog2.f32 %v101_v8 }
  0x16   :  { %v218_v27 = vpop.eup %217  ;;  %v82_v28 = vmul.f32 0.6931472, %v216_v22  ;;  %229 = vlog2.f32 %v102_v9  ;;  %v93_v43 = vmax.f32 %v78_v25, -100.0 }
  0x17   :  { %v220_v31 = vpop.eup %219  ;;  %v84_v32 = vmul.f32 0.6931472, %v218_v27  ;;  %231 = vlog2.f32 %v103_v13  ;;  %v94_v44 = vmax.f32 %v80_v26, -100.0 }
  0x18   :  { %v222_v35 = vpop.eup %221  ;;  %v86_v37 = vmul.f32 0.6931472, %v220_v31  ;;  %233 = vlog2.f32 %v104_v14  ;;  %v95_v47 = vmax.f32 %v82_v28, -100.0  ;;  %v133_v60 = vmul.f32 %v93_v43, %v347_v11 }
  0x19   :  { %v224_v40 = vpop.eup %223  ;;  %v88_v42 = vmul.f32 0.6931472, %v222_v35  ;;  %235 = vlog2.f32 %v105_v15  ;;  %v96_v48 = vmax.f32 %v84_v32, -100.0  ;;  %v134_v61 = vmul.f32 %v94_v44, %v349_v12 }
  0x1a   :  { %v226_v45 = vpop.eup %225  ;;  %v90_v46 = vmul.f32 0.6931472, %v224_v40  ;;  %237 = vlog2.f32 %v106_v19  ;;  %v97_v51 = vmax.f32 %v86_v37, -100.0  ;;  %v135_v1 = vmul.f32 %v95_v47, %v351_v17 }
  0x1b   :  { %v228_v49 = vpop.eup %227  ;;  %v92_v50 = vmul.f32 0.6931472, %v226_v45  ;;  %239 = vlog2.f32 %v107_v20  ;;  %v98_v54 = vmax.f32 %v88_v42, -100.0  ;;  %v136_v2 = vmul.f32 %v96_v48, %v353_v18 }
  0x1c   :  { %v230_v53 = vpop.eup %229  ;;  %v110_v55 = vmul.f32 0.6931472, %v228_v49  ;;  %241 = vlog2.f32 %v108_v21  ;;  %v99_v58 = vmax.f32 %v90_v46, -100.0  ;;  %v137_v7 = vmul.f32 %v97_v51, %v355_v23 }
  0x1d   :  { %v232_v57 = vpop.eup %231  ;;  %v112_v59 = vmul.f32 0.6931472, %v230_v53  ;;  %v100_v4 = vmax.f32 %v92_v50, -100.0  ;;  %v138_v11 = vmul.f32 %v98_v54, %v357_v24 }
  0x1e   :  { %v234_v62 = vpop.eup %233  ;;  %v114_v63 = vmul.f32 0.6931472, %v232_v57  ;;  %v125_v0 = vmax.f32 %v110_v55, -100.0  ;;  %v139_v16 = vmul.f32 %v99_v58, %v363_v36 }
  0x1f   :  { %v236_v3 = vpop.eup %235  ;;  %v116_v5 = vmul.f32 0.6931472, %v234_v62  ;;  %v126_v6 = vmax.f32 %v112_v59, -100.0  ;;  %v140_v36 = vmul.f32 %v100_v4, %v367_v41 }
  0x20   :  { %v238_v8 = vpop.eup %237  ;;  %v118_v9 = vmul.f32 0.6931472, %v236_v3  ;;  %v127_v10 = vmax.f32 %v114_v63, -100.0  ;;  %v149_v13 = vmul.f32 %v141_v29, %v125_v0 }
  0x21   :  { %v240_v12 = vpop.eup %239  ;;  %v120_v14 = vmul.f32 0.6931472, %v238_v8  ;;  %v128_v15 = vmax.f32 %v116_v5, -100.0  ;;  %v150_v17 = vmul.f32 %v142_v30, %v126_v6 }
  0x22   :  { %v242_v19 = vpop.eup %241  ;;  %v122_v18 = vmul.f32 0.6931472, %v240_v12  ;;  %v129_v20 = vmax.f32 %v118_v9, -100.0  ;;  %v151_v21 = vmul.f32 %v143_v33, %v127_v10  ;;  %v157_v22 = vadd.f32 %v149_v13, %v133_v60 }
  0x23   :  { %v124_v25 = vmul.f32 0.6931472, %v242_v19  ;;  %v130_v26 = vmax.f32 %v120_v14, -100.0  ;;  %v152_v23 = vmul.f32 %v144_v34, %v128_v15  ;;  %v158_v27 = vadd.f32 %v150_v17, %v134_v61 }
  0x24   :  { %v131_v28 = vmax.f32 %v122_v18, -100.0  ;;  %v153_v31 = vmul.f32 %v145_v38, %v129_v20  ;;  %v159_v32 = vadd.f32 %v151_v21, %v135_v1  ;;  %v165_v24 = vsub.f32 0.0, %v157_v22 }
  0x25   :  { %v132_v29 = vmax.f32 %v124_v25, -100.0  ;;  %v154_v35 = vmul.f32 %v146_v39, %v130_v26  ;;  %v160_v37 = vadd.f32 %v152_v23, %v136_v2  ;;  %v166_v40 = vsub.f32 0.0, %v158_v27 }
  0x26   :  { %v155_v30 = vmul.f32 %v147_v52, %v131_v28  ;;  %v161_v42 = vadd.f32 %v153_v31, %v137_v7  ;;  %v167_v43 = vsub.f32 0.0, %v159_v32 }
  0x27   :  { %v156_v44 = vmul.f32 %v148_v56, %v132_v29  ;;  %v162_v33 = vadd.f32 %v154_v35, %v138_v11  ;;  %v168_v45 = vsub.f32 0.0, %v160_v37  ;;  %v174_v46 = vadd.f32 %v166_v40, %v165_v24 }
  0x28   :  { %v163_v47 = vadd.f32 %v155_v30, %v139_v16  ;;  %v169_v34 = vsub.f32 0.0, %v161_v42 }
  0x29   :  { %v175_v48 = vadd.f32 %v174_v46, %v167_v43  ;;  %v164_v49 = vadd.f32 %v156_v44, %v140_v36  ;;  %v170_v38 = vsub.f32 0.0, %v162_v33 }
  0x2a   :  { %v171_v51 = vsub.f32 0.0, %v163_v47 }
  0x2b   :  { %v176_v50 = vadd.f32 %v175_v48, %v168_v45  ;;  %v172_v39 = vsub.f32 0.0, %v164_v49 }
  0x2d   :  { %v177_v53 = vadd.f32 %v176_v50, %v169_v34 }
  0x2f   :  { %v178_v54 = vadd.f32 %v177_v53, %v170_v38 }
  0x31   :  { %v179_v41 = vadd.f32 %v178_v54, %v171_v51 }
  0x33   :  { %v180_v52 = vadd.f32 %v179_v41, %v172_v39 }
  0x35   :  { %187 = vst [vmem:[#allocation8] sm:$0xff] %v180_v52 }
  0x36   :  { %198 = dma.vmem_to_hbm [thread:$0]  %s194_s1, 128, %s196_s23, [#allocation5]  }
  0x37   :  { %319 = dma.done.wait [#allocation5], 128  }
  0x38   :  { %320 = vsyncadd [#allocation5], 4294967168 }
  0x39   :  { %203 = vsyncpa [#allocation4], 1 }
  0x3a   :  { %204 = vsyncpa [#allocation7], 1 }
  0x3b   :  { %205 = vsyncpa [#allocation5], 1 }

</bundles_post_ra>
